<compile_context>
chip_gen: v6e
topology: v6e:2x2x1
jax: 0.10.0
libtpu: 0.0.40
codegen_flags: <defaults>
</compile_context>

<pallas_src>
import jax
import jax.numpy as jnp
from jax.experimental import pallas as pl
from jax.experimental.pallas import tpu as pltpu

_TARGET_BLOCK_BYTES = 4 << 20   # ~4 MiB blocks: good on v5e/v6e/v7x
_VMEM_LIMIT_BYTES = 48 << 20    # 2 in + 2 out bufs @ 4 MiB = 16 MiB; raise the
                                # 16/32 MiB scoped defaults, stay < 64 MiB (v7x)


def _srelu_kernel(alpha_ref, x_ref, o_ref):
    # alpha_ref: (1,) f32 in SMEM; x_ref/o_ref: VMEM tiles (any rank)
    alpha = alpha_ref[0]
    xf = x_ref[...].astype(jnp.float32)
    o_ref[...] = ((jnp.sqrt(xf * xf + alpha) + xf) * 0.5).astype(o_ref.dtype)


def _round_up(v, m):
    return ((v + m - 1) // m) * m


def _choose_row_tile(rows, width, itemsize, target_bytes):
    """Row tile: multiple of 32 sublanes (or the full dim), ~target_bytes per
    block, preferring a divisor of `rows` (full last block, unmasked stores)
    and an even grid count (balances v7x's 2 TensorCores)."""
    base = max(32, (target_bytes // (width * itemsize)) // 32 * 32)

    if rows <= base:
        # Whole array fits in at most one target-sized block.
        if rows >= 64 and rows % 64 == 0:
            return rows // 2            # grid = 2 full blocks (one per v7x TC)
        return rows                     # tiny input: single full-dim block

    # Many blocks: search a little below `base` for a multiple-of-32 tile that
    # divides rows; among divisors prefer an even grid count.
    best = None
    lo = max(32, base - 8 * 32)
    for rt in range(base, lo - 1, -32):
        if rows % rt == 0:
            if (rows // rt) % 2 == 0:
                return rt
            if best is None:
                best = rt
    return best if best is not None else base


def srelu(x, alpha=0.1):
    """Applies SRelu elementwise. x: any shape (e.g. NCHW). Same shape/dtype out."""
    orig_shape = x.shape
    orig_dtype = x.dtype
    n = x.size
    if n == 0:
        return x
    itemsize = jnp.dtype(orig_dtype).itemsize

    alpha_arr = jnp.asarray([alpha], dtype=jnp.float32)
    flat = jnp.ravel(x)

    smem_spec = pl.BlockSpec(memory_space=pltpu.MemorySpace.SMEM)
    cparams = pltpu.CompilerParams(
        dimension_semantics=("parallel",),
        vmem_limit_bytes=_VMEM_LIMIT_BYTES,
    )
    cost = pl.CostEstimate(
        flops=3 * n,
        transcendentals=n,
        bytes_accessed=2 * n * itemsize,
    )

    # --- pick a lane-dense slab width (big multiple of 128) that divides n ---
    width = None
    for w in (2048, 1024, 512, 256, 128):
        if n % w == 0 and n // w >= 8:
            width = w
            break
    if width is None:
        for w in (2048, 1024, 512, 256, 128):
            if n % w == 0:
                width = w
                break

    if width is not None:
        # Common path: contiguous lane-dense 2D slab, no pad / slice.
        rows = n // width
        x2d = flat.reshape(rows, width)
        row_tile = _choose_row_tile(rows, width, itemsize, _TARGET_BLOCK_BYTES)
        grid = (pl.cdiv(rows, row_tile),)

        out2d = pl.pallas_call(
            _srelu_kernel,
            out_shape=jax.ShapeDtypeStruct((rows, width), orig_dtype),
            grid_spec=pltpu.PrefetchScalarGridSpec(
                num_scalar_prefetch=0,
                grid=grid,
                in_specs=[
                    smem_spec,
                    pl.BlockSpec((row_tile, width), lambda i: (i, 0)),
                ],
                out_specs=pl.BlockSpec((row_tile, width), lambda i: (i, 0)),
            ),
            compiler_params=cparams,
            cost_estimate=cost,
        )(alpha_arr, x2d)
        return out2d.reshape(orig_shape)

    # --- rare fallback: n is not a multiple of 128 ---
    # Keep the data flat (no jnp.pad / slice HBM round trips); only the grid is
    # padded and Pallas masks the partial final block's writeback.  Garbage in
    # the uninitialized tail of the last input block is computed on but never
    # stored.
    blk = max(1024, (_TARGET_BLOCK_BYTES // itemsize) // 1024 * 1024)
    blk = min(blk, _round_up(n, 1024))
    grid = (pl.cdiv(n, blk),)

    out1d = pl.pallas_call(
        _srelu_kernel,
        out_shape=jax.ShapeDtypeStruct((n,), orig_dtype),
        grid_spec=pltpu.PrefetchScalarGridSpec(
            num_scalar_prefetch=0,
            grid=grid,
            in_specs=[
                smem_spec,
                pl.BlockSpec((blk,), lambda i: (i,)),
            ],
            out_specs=pl.BlockSpec((blk,), lambda i: (i,)),
        ),
        compiler_params=cparams,
        cost_estimate=cost,
    )(alpha_arr, flat)
    return out1d.reshape(orig_shape)


def srelu_ref(x, alpha=0.1):
    xf = x.astype(jnp.float32)
    return ((jnp.sqrt(xf * xf + alpha) + xf) / 2.0).astype(x.dtype)


if __name__ == "__main__":
    key = jax.random.PRNGKey(0)
    # NCHW input, small shapes
    x = jax.random.normal(key, (2, 4, 16, 16), dtype=jnp.float32)

    out = srelu(x, alpha=0.1)
    out = jax.block_until_ready(out)

    ref = srelu_ref(x, alpha=0.1)
    assert out.shape == x.shape and out.dtype == x.dtype
    assert jnp.allclose(out, ref, atol=1e-6, rtol=1e-6), "mismatch vs reference"

    print("KERNEL_OK")
</pallas_src>

<mosaic_0001>
module attributes {stable_mosaic.version = 11 : i64} {
  func.func @_srelu_kernel(%arg0: i32, %arg1: memref<1xf32, #tpu.memory_space<smem>>, %arg2: memref<8x256xf32, #tpu.memory_space<vmem>>, %arg3: memref<8x256xf32, #tpu.memory_space<vmem>>) attributes {dimension_semantics = [#tpu.dimension_semantics<parallel>], iteration_bounds = array<i64: 1>, scalar_prefetch = 0 : i64, scratch_operands = 0 : i64, tpu.core_type = #tpu.core_type<tc>, window_params = [{transform_indices = @transform_0, window_bounds = array<i64: 1>}, {transform_indices = @transform_1, window_bounds = array<i64: 8, 256>}, {transform_indices = @transform_2, window_bounds = array<i64: 8, 256>}]} {
    %c0 = arith.constant 0 : index
    %0 = memref.load %arg1[%c0] : memref<1xf32, #tpu.memory_space<smem>>
    %c0_0 = arith.constant 0 : index
    %c0_1 = arith.constant 0 : index
    %1 = vector.load %arg2[%c0_0, %c0_1] : memref<8x256xf32, #tpu.memory_space<vmem>>, vector<8x256xf32>
    %2 = arith.mulf %1, %1 : vector<8x256xf32>
    %3 = vector.broadcast %0 : f32 to vector<8x256xf32>
    %4 = arith.addf %2, %3 : vector<8x256xf32>
    %5 = math.sqrt %4 : vector<8x256xf32>
    %6 = arith.addf %5, %1 : vector<8x256xf32>
    %cst = arith.constant 5.000000e-01 : f32
    %7 = vector.broadcast %cst : f32 to vector<8x256xf32>
    %8 = arith.mulf %6, %7 : vector<8x256xf32>
    %c0_2 = arith.constant 0 : index
    %c0_3 = arith.constant 0 : index
    %9 = vector.load %arg3[%c0_2, %c0_3] : memref<8x256xf32, #tpu.memory_space<vmem>>, vector<8x256xf32>
    tpu.vector_store %arg3[%c0_2, %c0_3], %8 {strides = array<i32>} : memref<8x256xf32, #tpu.memory_space<vmem>>, vector<8x256xf32>,
    return
  }
  func.func @transform_0(%arg0: i32) -> i32 {
    %c0_i32 = arith.constant 0 : i32
    %c0_i32_0 = arith.constant 0 : i32
    return %c0_i32 : i32
  }
  func.func @transform_1(%arg0: i32) -> (i32, i32) {
    %c0_i32 = arith.constant 0 : i32
    %c0_i32_0 = arith.constant 0 : i32
    return %arg0, %c0_i32 : i32, i32
  }
  func.func @transform_2(%arg0: i32) -> (i32, i32) {
    %c0_i32 = arith.constant 0 : i32
    %c0_i32_0 = arith.constant 0 : i32
    return %arg0, %c0_i32 : i32, i32
  }
}

</mosaic_0001>

<bundles_post_ra>
// kernel: tpu_custom_call.1
= control target key start
LH: loop header
LB: loop body
LE: loop exit
PB: predicated region body
PF: predicated region fallthrough
CT: control target
= control target key end

     0   :  { %8 = vsyncpa [#allocation4], 0  ;;  %s144_s0 = inlined_call_operand.<no memory space> [shape: f32[1], index: 0, kind: input, shape index: {}]   ;;  %s145_s1 = inlined_call_operand.hbm [shape: f32[8,256], index: 1, kind: input, shape index: {}]   ;;  %s146_s2 = inlined_call_operand.hbm [shape: f32[8,256], index: 2, kind: output, shape index: {}]  }
   0x1   :  { %9 = vsyncpa [#allocation5], 0  ;;  %s118_s9 = smov [#allocation3]  }
   0x2   :  { %s18_s10 = sshll.u32 %s118_s9, 4  ;;  %s19_s10 = int_to_ptr.vmem [resolvable:$true] %s18_s10 }
   0x3   :  { %s82_s11 = scalar_lea.vmem %s19_s10, 256  ;;  %p87_p1 = scmp.lt.s32.totalorder %s19_s10, %s19_s10 }
   0x4   :  { %p83_p0 = scmp.ne.s32.totalorder %s19_s10, %s82_s11  ;;  %p88_p2 = scmp.lt.s32.totalorder %s82_s11, %s82_s11 }
   0x6   :  { %p89_p3 = por %p88_p2, %p87_p1 }
   0x8   :  { %p90_p4 = pnand %p89_p3, %p83_p0 }
   0xa   :  { %93 = shalt.err (!%p90_p4)
}
   0xb   :  { %21 = dma.hbm_to_vmem [thread:$0]  %s145_s1, 256, %s19_s10, [#allocation4]  }
   0xc   :  { %114 = dma.done.wait [#allocation4], 256  }
   0xd   :  { %115 = vsyncadd [#allocation4], 4294967040  ;;  %v26_v0 = vld [vmem:[#allocation3] sm:$0xff]  ;;  %v30_v1 = vstv %s144_s0  ;;  %v27_v2 = vld [vmem:[#allocation3 + $0x8] sm:$0xff]  ;;  %s119_s0 = smov [#allocation6]  }
   0xe   :  { %v28_v3 = vmul.f32 %v26_v0, %v26_v0  ;;  %v29_v4 = vmul.f32 %v27_v2, %v27_v2  ;;  %s59_s1 = sshll.u32 %s119_s0, 4  ;;  %s60_s1 = int_to_ptr.vmem [resolvable:$true] %s59_s1 }
   0xf   :  { %s94_s16 = scalar_lea.vmem %s60_s1, 256  ;;  %p99_p6 = scmp.lt.s32.totalorder %s60_s1, %s60_s1 }
  0x10   :  { %v31_v5 = vadd.f32 %v30_v1, %v28_v3  ;;  %v32_v6 = vadd.f32 %v30_v1, %v29_v4  ;;  %p95_p5 = scmp.ne.s32.totalorder %s60_s1, %s94_s16  ;;  %p100_p7 = scmp.lt.s32.totalorder %s94_s16, %s94_s16 }
  0x12   :  { %70 = vrsqrt.f32 %v31_v5  ;;  %vm35_vm0 = vcmp.eq.f32.partialorder %v31_v5, inf  ;;  %v38_v8 = vand.u32 2147483648, %v31_v5  ;;  %vm37_vm1 = vcmp.eq.f32.partialorder %v31_v5, 0.0  ;;  %p101_p8 = por %p100_p7, %p99_p6 }
  0x13   :  { %72 = vrsqrt.f32 %v32_v6  ;;  %vm42_vm2 = vcmp.eq.f32.partialorder %v32_v6, inf  ;;  %v45_v11 = vand.u32 2147483648, %v32_v6  ;;  %vm44_vm3 = vcmp.eq.f32.partialorder %v32_v6, 0.0 }
  0x14   :  { %p102_p9 = pnand %p101_p8, %p95_p5 }
  0x1f   :  { %v71_v7 = vpop.eup %70 }
  0x20   :  { %v73_v9 = vpop.eup %72  ;;  %v34_v10 = vmul.f32 %v71_v7, %v31_v5 }
  0x21   :  { %v41_v12 = vmul.f32 %v73_v9, %v32_v6 }
  0x22   :  { %v36_v13 = vsel %vm35_vm0, %v31_v5, %v34_v10 }
  0x23   :  { %v39_v14 = vsel %vm37_vm1, %v38_v8, %v36_v13  ;;  %v43_v15 = vsel %vm42_vm2, %v32_v6, %v41_v12 }
  0x24   :  { %v47_v16 = vadd.f32 %v39_v14, %v26_v0  ;;  %v46_v17 = vsel %vm44_vm3, %v45_v11, %v43_v15 }
  0x25   :  { %v48_v18 = vadd.f32 %v46_v17, %v27_v2 }
  0x26   :  { %v49_v19 = vmul.f32 0.5, %v47_v16 }
  0x27   :  { %v50_v20 = vmul.f32 0.5, %v48_v18 }
  0x28   :  { %51 = vst [vmem:[#allocation6] sm:$0xff] %v49_v19 }
  0x29   :  { %52 = vst [vmem:[#allocation6 + $0x8] sm:$0xff] %v50_v20 }
  0x2a   :  { %105 = shalt.err (!%p102_p9)
}
  0x2b   :  { %62 = dma.vmem_to_hbm [thread:$0]  %s60_s1, 256, %s146_s2, [#allocation5]  }
  0x2c   :  { %116 = dma.done.wait [#allocation5], 256  }
  0x2d   :  { %117 = vsyncadd [#allocation5], 4294967040 }
  0x2e   :  { %66 = vsyncpa [#allocation4], 1 }
  0x2f   :  { %67 = vsyncpa [#allocation5], 1 }

</bundles_post_ra>
